<compile_context>
chip_gen: v7x
topology: tpu7x:2x2x1
jax: 0.10.0
libtpu: 0.0.40
codegen_flags: <defaults>
</compile_context>

<pallas_src>
import math

import jax
import jax.numpy as jnp
from jax import lax
from jax.experimental import pallas as pl
from jax.experimental.pallas import tpu as pltpu
import numpy as np


def _cdiv(a, b):
    return -(-a // b)


def _round_up(v, m):
    return _cdiv(v, m) * m


# --------------------------------------------------------------------------
# Kernel
# --------------------------------------------------------------------------
def _encoder_conv_kernel(x_e_ref, x_o_ref, mfirst_ref, mlast_ref,
                         bn1s_ref, bn1b_ref, w1_ref, b1_ref,
                         bn2s_ref, bn2b_ref, w2_ref, b2_ref,
                         wd_ref, bd_ref,
                         out_ref, out1e_ref, out1o_ref):
    """One grid step: `batch_block` whole sequences, time on lanes.

    X = batch_block * (L//2) lanes.  All arrays are lane-dense:
      x_e/x_o:       (Cin,  X)  even / odd timesteps of the raw input
      out1e/out1o:   (Cout, X)  conv1d_1 output at even / odd positions
      out:           (Cout, X)  downsample(x) + conv1d_2(h2) (stride-2 output)
    """
    f32 = jnp.float32
    cd = w1_ref.dtype
    X = x_e_ref.shape[1]

    m_first = mfirst_ref[...]            # (1, X): 0 where pos % Lh == 0
    m_last = mlast_ref[...]              # (1, X): 0 where pos % Lh == Lh - 1

    # ---- BN1 (eval, folded) + ReLU on both time parities (f32 math) -------
    s1, t1 = bn1s_ref[...], bn1b_ref[...]                     # (Cin, 1)
    h1_e = jnp.maximum(x_e_ref[...].astype(f32) * s1 + t1, 0.0)   # h1[2j]
    h1_o = jnp.maximum(x_o_ref[...].astype(f32) * s1 + t1, 0.0)   # h1[2j+1]

    # Neighbouring taps via lane rolls; sequence boundaries zeroed (== conv
    # zero padding).  roll(+1) -> value from lane j-1; roll(X-1) -> lane j+1.
    h1_om1 = (pltpu.roll(h1_o, shift=1, axis=1) * m_first)        # h1[2j-1]
    h1_ep1 = (pltpu.roll(h1_e, shift=X - 1, axis=1) * m_last)     # h1[2j+2]

    def mm(w, h_cd):                     # (Cout,C)@(C,X) -> f32 (Cout,X)
        return jnp.dot(w, h_cd, preferred_element_type=f32)

    h1_e_c, h1_o_c = h1_e.astype(cd), h1_o.astype(cd)
    h1_om1_c, h1_ep1_c = h1_om1.astype(cd), h1_ep1.astype(cd)

    # ---- conv1d_1: k=3, pad=1, stride=1 — per-tap matmuls, f32 accumulate --
    w10, w11, w12 = w1_ref[0], w1_ref[1], w1_ref[2]               # (Cout, Cin)
    b1 = b1_ref[...]                                              # (Cout, 1)
    o1_e = mm(w10, h1_om1_c) + mm(w11, h1_e_c) + mm(w12, h1_o_c) + b1
    o1_o = mm(w10, h1_e_c) + mm(w11, h1_o_c) + mm(w12, h1_ep1_c) + b1
    out1e_ref[...] = o1_e.astype(out1e_ref.dtype)
    out1o_ref[...] = o1_o.astype(out1o_ref.dtype)

    # ---- BN2 (eval) + ReLU (kept in registers; no VMEM staging) ------------
    s2, t2 = bn2s_ref[...], bn2b_ref[...]                         # (Cout, 1)
    h2_e = jnp.maximum(o1_e * s2 + t2, 0.0)                       # h2[2j]
    h2_o = jnp.maximum(o1_o * s2 + t2, 0.0)                       # h2[2j+1]
    h2_om1 = pltpu.roll(h2_o, shift=1, axis=1) * m_first          # h2[2j-1]

    # ---- conv1d_2: k=3, pad=1, stride=2 — only the even output positions ---
    w20, w21, w22 = w2_ref[0], w2_ref[1], w2_ref[2]               # (Cout, Cout)
    o2 = (mm(w20, h2_om1.astype(cd)) + mm(w21, h2_e.astype(cd))
          + mm(w22, h2_o.astype(cd)) + b2_ref[...])

    # ---- downsample: k=1, stride=2 on the raw input -------------------------
    ds = mm(wd_ref[...], x_e_ref[...].astype(cd)) + bd_ref[...]

    out_ref[...] = (ds + o2).astype(out_ref.dtype)


# --------------------------------------------------------------------------
# VMEM budgeting / blocking
# --------------------------------------------------------------------------
def _vmem_capacity_bytes():
    try:
        info = pltpu.get_tpu_info()
        for attr in ("vmem_capacity_bytes", "vmem_bytes", "vmem_size_bytes"):
            v = getattr(info, attr, None)
            if v:
                return int(v)
    except Exception:
        pass
    return 64 * 1024 * 1024          # conservative: v7x per-TensorCore VMEM


def _step_vmem_bytes(nb, half_len, cin, cout, stream_bytes, compute_bytes):
    """(8,128)-tile-padded VMEM footprint of one grid step: double-buffered
    inputs/outputs plus a generous bound on live intermediates."""
    lanes = _round_up(nb * half_len, 128)

    def slab(rows, bpe):
        return _round_up(max(rows, 1), 8) * lanes * bpe

    x_in = 2 * 2 * slab(cin, stream_bytes)          # x_e, x_o (double-buffered)
    outs = 2 * 3 * slab(cout, 4)                    # out, out1_e, out1_o (f32)
    interm = (6 * slab(cin, 4) + 4 * slab(cin, compute_bytes)
              + 8 * slab(cout, 4) + 6 * slab(cout, compute_bytes))
    masks = 2 * slab(1, 4)
    weights = 64 * 1024                             # BN/conv params, padded
    return x_in + outs + interm + masks + weights


def _choose_blocking(n, half_len, cin, cout, stream_bytes, compute_bytes,
                     budget_bytes, batch_block=None):
    """Pick (batch_block, n_steps).

    batch_block is a multiple of `align` so every block's lane extent
    (batch_block * half_len) is a multiple of 128 (BlockSpec tiling rule); it
    is VMEM-budgeted with padded accounting, and capped so the grid keeps at
    least two steps (software pipelining + v7x megacore).
    """
    align = 128 // math.gcd(half_len, 128)
    if batch_block is not None:
        nb = align * _cdiv(max(1, int(batch_block)), align)
    else:
        nb = align
        cap = _round_up(max(n, 1), align)
        while (nb + align <= cap
               and _step_vmem_bytes(nb + align, half_len, cin, cout,
                                    stream_bytes, compute_bytes) <= budget_bytes):
            nb += align
        nb_two_steps = align * _cdiv(_cdiv(max(n, 2), 2), align)
        nb = max(align, min(nb, nb_two_steps))
    n_steps = max(2 if n > 1 else 1, _cdiv(n, nb))
    return nb, n_steps


# --------------------------------------------------------------------------
# Wrapper
# --------------------------------------------------------------------------
def encoder_conv_layer(x_ncl, params, *, eps=1e-5, batch_block=None,
                       compute_dtype=jnp.bfloat16):
    """Eval-mode EncoderConvLayer forward.

    x_ncl: (N, Cin, L) float32 (NCL, like the PyTorch module).
    Returns (out, out1) in NCL layout: (N, Cout, L//2), (N, Cout, L), float32.
    compute_dtype: dtype of the streamed activations and the MXU operands
      (bf16 recommended on v6e/v7x); BN/ReLU math and accumulation stay f32.
    """
    N, Cin, L = x_ncl.shape
    Cout = params["w1"].shape[0]
    assert L % 2 == 0, "stride-2 path assumes even L"
    Lh = L // 2

    cd = jnp.dtype(compute_dtype)
    stream_bytes = compute_bytes = cd.itemsize

    vmem_cap = _vmem_capacity_bytes()
    usable = int(vmem_cap * 0.75)               # headroom for spills / compiler
    nb, n_steps = _choose_blocking(N, Lh, Cin, Cout, stream_bytes,
                                   compute_bytes, usable // 2, batch_block)
    Np = nb * n_steps
    X = nb * Lh
    est = _step_vmem_bytes(nb, Lh, Cin, Cout, stream_bytes, compute_bytes)
    vmem_limit = int(min(usable, max(32 * 1024 * 1024, 2 * est)))

    # ---- parameters: fold eval-mode BatchNorm, split conv taps -------------
    bn1_s = (params["g1"] / jnp.sqrt(params["v1"] + eps)).reshape(Cin, 1)
    bn1_b = (params["be1"] - params["m1"] * bn1_s[:, 0]).reshape(Cin, 1)
    bn2_s = (params["g2"] / jnp.sqrt(params["v2"] + eps)).reshape(Cout, 1)
    bn2_b = (params["be2"] - params["m2"] * bn2_s[:, 0]).reshape(Cout, 1)

    w1 = jnp.transpose(params["w1"], (2, 0, 1)).astype(cd)        # (3,Cout,Cin)
    w2 = jnp.transpose(params["w2"], (2, 0, 1)).astype(cd)        # (3,Cout,Cout)
    wd = params["wd"][:, :, 0].astype(cd)                         # (Cout,Cin)
    b1 = params["b1"].reshape(Cout, 1)
    b2 = params["b2"].reshape(Cout, 1)
    bd = params["bd"].reshape(Cout, 1)

    # Sequence-boundary masks for the lane rolls (resident, reused per step).
    j = jnp.arange(X, dtype=jnp.int32) % Lh
    m_first = (j != 0).astype(jnp.float32).reshape(1, X)
    m_last = (j != Lh - 1).astype(jnp.float32).reshape(1, X)

    # ---- repack: channels -> sublanes, (batch, time/2) -> lanes ------------
    x_cl = jnp.transpose(x_ncl, (1, 0, 2))                        # (Cin, N, L)
    if Np != N:
        x_cl = jnp.concatenate(
            [x_cl, jnp.zeros((Cin, Np - N, L), x_cl.dtype)], axis=1)
    x_e = x_cl[:, :, 0::2].reshape(Cin, Np * Lh).astype(cd)       # even steps
    x_o = x_cl[:, :, 1::2].reshape(Cin, Np * Lh).astype(cd)       # odd steps

    full = lambda *shape: pl.BlockSpec(shape, lambda s: (0,) * len(shape))
    seq_in = pl.BlockSpec((Cin, X), lambda s: (0, s))
    seq_out = pl.BlockSpec((Cout, X), lambda s: (0, s))

    out_f, out1e_f, out1o_f = pl.pallas_call(
        _encoder_conv_kernel,
        out_shape=(jax.ShapeDtypeStruct((Cout, Np * Lh), jnp.float32),
                   jax.ShapeDtypeStruct((Cout, Np * Lh), jnp.float32),
                   jax.ShapeDtypeStruct((Cout, Np * Lh), jnp.float32)),
        grid_spec=pltpu.PrefetchScalarGridSpec(
            num_scalar_prefetch=0,
            grid=(n_steps,),
            in_specs=[
                seq_in, seq_in,                          # x_e, x_o
                full(1, X), full(1, X),                  # boundary masks
                full(Cin, 1), full(Cin, 1),              # bn1 scale / shift
                full(3, Cout, Cin), full(Cout, 1),       # conv1 taps / bias
                full(Cout, 1), full(Cout, 1),            # bn2 scale / shift
                full(3, Cout, Cout), full(Cout, 1),      # conv2 taps / bias
                full(Cout, Cin), full(Cout, 1),          # downsample / bias
            ],
            out_specs=[seq_out, seq_out, seq_out],
        ),
        compiler_params=pltpu.CompilerParams(
            dimension_semantics=("parallel",),           # batch groups independent
            vmem_limit_bytes=vmem_limit),
    )(x_e, x_o, m_first, m_last, bn1_s, bn1_b, w1, b1,
      bn2_s, bn2_b, w2, b2, wd, bd)

    # ---- unpack back to NCL -------------------------------------------------
    out = out_f.reshape(Cout, Np, Lh)[:, :N]                      # (Cout,N,Lh)
    o1e = out1e_f.reshape(Cout, Np, Lh)[:, :N]
    o1o = out1o_f.reshape(Cout, Np, Lh)[:, :N]
    out1 = jnp.stack([o1e, o1o], axis=-1).reshape(Cout, N, L)     # interleave
    return jnp.transpose(out, (1, 0, 2)), jnp.transpose(out1, (1, 0, 2))


# --------------------------------------------------------------------------
# Pure-JAX reference (eval-mode BN, identity dropout) and test
# --------------------------------------------------------------------------
def _reference_forward(x, p, eps=1e-5):
    dn = ("NCH", "OIH", "NCH")

    def bn(v, g, b, m, var):
        return ((v - m[None, :, None]) / jnp.sqrt(var + eps)[None, :, None]
                * g[None, :, None] + b[None, :, None])

    h1 = jax.nn.relu(bn(x, p["g1"], p["be1"], p["m1"], p["v1"]))
    out1 = lax.conv_general_dilated(h1, p["w1"], (1,), [(1, 1)],
                                    dimension_numbers=dn) + p["b1"][None, :, None]
    h2 = jax.nn.relu(bn(out1, p["g2"], p["be2"], p["m2"], p["v2"]))
    out2 = lax.conv_general_dilated(h2, p["w2"], (2,), [(1, 1)],
                                    dimension_numbers=dn) + p["b2"][None, :, None]
    ds = lax.conv_general_dilated(x, p["wd"], (2,), [(0, 0)],
                                  dimension_numbers=dn) + p["bd"][None, :, None]
    return ds + out2, out1


if __name__ == "__main__":
    N, Cin, Cout, L = 4, 4, 8, 16

    key = jax.random.PRNGKey(0)
    ks = jax.random.split(key, 16)
    params = {
        "w1": 0.1 * jax.random.normal(ks[0], (Cout, Cin, 3), jnp.float32),
        "b1": 0.1 * jax.random.normal(ks[1], (Cout,), jnp.float32),
        "w2": 0.1 * jax.random.normal(ks[2], (Cout, Cout, 3), jnp.float32),
        "b2": 0.1 * jax.random.normal(ks[3], (Cout,), jnp.float32),
        "wd": 0.1 * jax.random.normal(ks[4], (Cout, Cin, 1), jnp.float32),
        "bd": 0.1 * jax.random.normal(ks[5], (Cout,), jnp.float32),
        # BatchNorm1d(dim_in)
        "g1": 1.0 + 0.1 * jax.random.normal(ks[6], (Cin,), jnp.float32),
        "be1": 0.1 * jax.random.normal(ks[7], (Cin,), jnp.float32),
        "m1": 0.1 * jax.random.normal(ks[8], (Cin,), jnp.float32),
        "v1": jax.random.uniform(ks[9], (Cin,), jnp.float32, 0.5, 1.5),
        # BatchNorm1d(dim_out)
        "g2": 1.0 + 0.1 * jax.random.normal(ks[10], (Cout,), jnp.float32),
        "be2": 0.1 * jax.random.normal(ks[11], (Cout,), jnp.float32),
        "m2": 0.1 * jax.random.normal(ks[12], (Cout,), jnp.float32),
        "v2": jax.random.uniform(ks[13], (Cout,), jnp.float32, 0.5, 1.5),
    }

    x = jax.random.normal(ks[14], (N, Cin, L), jnp.float32)       # NCL like PyTorch

    ref_out, ref_out1 = _reference_forward(x, params)

    # f32 operands: tight tolerance; exercises the >=2-step pipelined grid.
    out, out1 = jax.block_until_ready(
        encoder_conv_layer(x, params, compute_dtype=jnp.float32))
    assert out.shape == (N, Cout, L // 2) and out1.shape == (N, Cout, L)
    np.testing.assert_allclose(np.asarray(out), np.asarray(ref_out), atol=1e-4, rtol=1e-4)
    np.testing.assert_allclose(np.asarray(out1), np.asarray(ref_out1), atol=1e-4, rtol=1e-4)

    # Default path: bf16 streaming + bf16 MXU operands; looser tolerance.
    out_bf, out1_bf = jax.block_until_ready(encoder_conv_layer(x, params))
    np.testing.assert_allclose(np.asarray(out_bf), np.asarray(ref_out), atol=5e-2, rtol=5e-2)
    np.testing.assert_allclose(np.asarray(out1_bf), np.asarray(ref_out1), atol=5e-2, rtol=5e-2)

    print("KERNEL_OK")
</pallas_src>

<mosaic_0001>
module attributes {stable_mosaic.version = 11 : i64} {
  func.func @_encoder_conv_kernel(%arg0: i32, %arg1: memref<4x128xf32, #tpu.memory_space<vmem>>, %arg2: memref<4x128xf32, #tpu.memory_space<vmem>>, %arg3: memref<1x128xf32, #tpu.memory_space<vmem>>, %arg4: memref<1x128xf32, #tpu.memory_space<vmem>>, %arg5: memref<4x1xf32, #tpu.memory_space<vmem>>, %arg6: memref<4x1xf32, #tpu.memory_space<vmem>>, %arg7: memref<3x8x4xf32, #tpu.memory_space<vmem>>, %arg8: memref<8x1xf32, #tpu.memory_space<vmem>>, %arg9: memref<8x1xf32, #tpu.memory_space<vmem>>, %arg10: memref<8x1xf32, #tpu.memory_space<vmem>>, %arg11: memref<3x8x8xf32, #tpu.memory_space<vmem>>, %arg12: memref<8x1xf32, #tpu.memory_space<vmem>>, %arg13: memref<8x4xf32, #tpu.memory_space<vmem>>, %arg14: memref<8x1xf32, #tpu.memory_space<vmem>>, %arg15: memref<8x128xf32, #tpu.memory_space<vmem>>, %arg16: memref<8x128xf32, #tpu.memory_space<vmem>>, %arg17: memref<8x128xf32, #tpu.memory_space<vmem>>) attributes {dimension_semantics = [#tpu.dimension_semantics<parallel>], iteration_bounds = array<i64: 2>, scalar_prefetch = 0 : i64, scratch_operands = 0 : i64, tpu.core_type = #tpu.core_type<tc>, window_params = [{transform_indices = @transform_0, window_bounds = array<i64: 4, 128>}, {transform_indices = @transform_1, window_bounds = array<i64: 4, 128>}, {pipeline_mode = #tpu.pipeline_mode<synchronous>, transform_indices = @transform_2, window_bounds = array<i64: 1, 128>}, {pipeline_mode = #tpu.pipeline_mode<synchronous>, transform_indices = @transform_3, window_bounds = array<i64: 1, 128>}, {pipeline_mode = #tpu.pipeline_mode<synchronous>, transform_indices = @transform_4, window_bounds = array<i64: 4, 1>}, {pipeline_mode = #tpu.pipeline_mode<synchronous>, transform_indices = @transform_5, window_bounds = array<i64: 4, 1>}, {pipeline_mode = #tpu.pipeline_mode<synchronous>, transform_indices = @transform_6, window_bounds = array<i64: 3, 8, 4>}, {pipeline_mode = #tpu.pipeline_mode<synchronous>, transform_indices = @transform_7, window_bounds = array<i64: 8, 1>}, {pipeline_mode = #tpu.pipeline_mode<synchronous>, transform_indices = @transform_8, window_bounds = array<i64: 8, 1>}, {pipeline_mode = #tpu.pipeline_mode<synchronous>, transform_indices = @transform_9, window_bounds = array<i64: 8, 1>}, {pipeline_mode = #tpu.pipeline_mode<synchronous>, transform_indices = @transform_10, window_bounds = array<i64: 3, 8, 8>}, {pipeline_mode = #tpu.pipeline_mode<synchronous>, transform_indices = @transform_11, window_bounds = array<i64: 8, 1>}, {pipeline_mode = #tpu.pipeline_mode<synchronous>, transform_indices = @transform_12, window_bounds = array<i64: 8, 4>}, {pipeline_mode = #tpu.pipeline_mode<synchronous>, transform_indices = @transform_13, window_bounds = array<i64: 8, 1>}, {transform_indices = @transform_14, window_bounds = array<i64: 8, 128>}, {transform_indices = @transform_15, window_bounds = array<i64: 8, 128>}, {transform_indices = @transform_16, window_bounds = array<i64: 8, 128>}]} {
    %c0 = arith.constant 0 : index
    %c0_0 = arith.constant 0 : index
    %0 = vector.load %arg3[%c0, %c0_0] : memref<1x128xf32, #tpu.memory_space<vmem>>, vector<1x128xf32>
    %c0_1 = arith.constant 0 : index
    %c0_2 = arith.constant 0 : index
    %1 = vector.load %arg4[%c0_1, %c0_2] : memref<1x128xf32, #tpu.memory_space<vmem>>, vector<1x128xf32>
    %c0_3 = arith.constant 0 : index
    %c0_4 = arith.constant 0 : index
    %2 = vector.load %arg5[%c0_3, %c0_4] : memref<4x1xf32, #tpu.memory_space<vmem>>, vector<4x1xf32>
    %c0_5 = arith.constant 0 : index
    %c0_6 = arith.constant 0 : index
    %3 = vector.load %arg6[%c0_5, %c0_6] : memref<4x1xf32, #tpu.memory_space<vmem>>, vector<4x1xf32>
    %c0_7 = arith.constant 0 : index
    %c0_8 = arith.constant 0 : index
    %4 = vector.load %arg1[%c0_7, %c0_8] : memref<4x128xf32, #tpu.memory_space<vmem>>, vector<4x128xf32>
    %5 = vector.broadcast %2 : vector<4x1xf32> to vector<4x128xf32>
    %6 = arith.mulf %4, %5 : vector<4x128xf32>
    %7 = vector.broadcast %3 : vector<4x1xf32> to vector<4x128xf32>
    %8 = arith.addf %6, %7 : vector<4x128xf32>
    %cst = arith.constant 0.000000e+00 : f32
    %9 = vector.broadcast %cst : f32 to vector<4x128xf32>
    %10 = arith.maximumf %8, %9 : vector<4x128xf32>
    %c0_9 = arith.constant 0 : index
    %c0_10 = arith.constant 0 : index
    %11 = vector.load %arg2[%c0_9, %c0_10] : memref<4x128xf32, #tpu.memory_space<vmem>>, vector<4x128xf32>
    %12 = vector.broadcast %2 : vector<4x1xf32> to vector<4x128xf32>
    %13 = arith.mulf %11, %12 : vector<4x128xf32>
    %14 = vector.broadcast %3 : vector<4x1xf32> to vector<4x128xf32>
    %15 = arith.addf %13, %14 : vector<4x128xf32>
    %cst_11 = arith.constant 0.000000e+00 : f32
    %16 = vector.broadcast %cst_11 : f32 to vector<4x128xf32>
    %17 = arith.maximumf %15, %16 : vector<4x128xf32>
    %c1_i32 = arith.constant 1 : i32
    %18 = tpu.dynamic_rotate %17 by %c1_i32 dim 1 : vector<4x128xf32>, i32 -> vector<4x128xf32>
    %19 = vector.broadcast %0 : vector<1x128xf32> to vector<4x128xf32>
    %20 = arith.mulf %18, %19 : vector<4x128xf32>
    %c127_i32 = arith.constant 127 : i32
    %21 = tpu.dynamic_rotate %10 by %c127_i32 dim 1 : vector<4x128xf32>, i32 -> vector<4x128xf32>
    %22 = vector.broadcast %1 : vector<1x128xf32> to vector<4x128xf32>
    %23 = arith.mulf %21, %22 : vector<4x128xf32>
    %c0_12 = arith.constant 0 : index
    %c0_13 = arith.constant 0 : index
    %c0_14 = arith.constant 0 : index
    %24 = vector.load %arg7[%c0_12, %c0_13, %c0_14] : memref<3x8x4xf32, #tpu.memory_space<vmem>>, vector<1x8x4xf32>
    %25 = vector.shape_cast %24 : vector<1x8x4xf32> to vector<8x4xf32>
    %c1 = arith.constant 1 : index
    %c0_15 = arith.constant 0 : index
    %c0_16 = arith.constant 0 : index
    %26 = vector.load %arg7[%c1, %c0_15, %c0_16] : memref<3x8x4xf32, #tpu.memory_space<vmem>>, vector<1x8x4xf32>
    %27 = vector.shape_cast %26 : vector<1x8x4xf32> to vector<8x4xf32>
    %c2 = arith.constant 2 : index
    %c0_17 = arith.constant 0 : index
    %c0_18 = arith.constant 0 : index
    %28 = vector.load %arg7[%c2, %c0_17, %c0_18] : memref<3x8x4xf32, #tpu.memory_space<vmem>>, vector<1x8x4xf32>
    %29 = vector.shape_cast %28 : vector<1x8x4xf32> to vector<8x4xf32>
    %c0_19 = arith.constant 0 : index
    %c0_20 = arith.constant 0 : index
    %30 = vector.load %arg8[%c0_19, %c0_20] : memref<8x1xf32, #tpu.memory_space<vmem>>, vector<8x1xf32>
    %cst_21 = arith.constant dense<0.000000e+00> : vector<8x128xf32>
    %31 = tpu.matmul %25, %20, %cst_21 {dimension_numbers = #tpu.dot_dimension_numbers<[1], [0], [0], [1], [0, 0, 1, 1], [], []>} : vector<8x4xf32>, vector<4x128xf32>, vector<8x128xf32> -> vector<8x128xf32>
    %cst_22 = arith.constant dense<0.000000e+00> : vector<8x128xf32>
    %32 = tpu.matmul %27, %10, %cst_22 {dimension_numbers = #tpu.dot_dimension_numbers<[1], [0], [0], [1], [0, 0, 1, 1], [], []>} : vector<8x4xf32>, vector<4x128xf32>, vector<8x128xf32> -> vector<8x128xf32>
    %33 = arith.addf %31, %32 : vector<8x128xf32>
    %cst_23 = arith.constant dense<0.000000e+00> : vector<8x128xf32>
    %34 = tpu.matmul %29, %17, %cst_23 {dimension_numbers = #tpu.dot_dimension_numbers<[1], [0], [0], [1], [0, 0, 1, 1], [], []>} : vector<8x4xf32>, vector<4x128xf32>, vector<8x128xf32> -> vector<8x128xf32>
    %35 = arith.addf %33, %34 : vector<8x128xf32>
    %36 = vector.broadcast %30 : vector<8x1xf32> to vector<8x128xf32>
    %37 = arith.addf %35, %36 : vector<8x128xf32>
    %cst_24 = arith.constant dense<0.000000e+00> : vector<8x128xf32>
    %38 = tpu.matmul %25, %10, %cst_24 {dimension_numbers = #tpu.dot_dimension_numbers<[1], [0], [0], [1], [0, 0, 1, 1], [], []>} : vector<8x4xf32>, vector<4x128xf32>, vector<8x128xf32> -> vector<8x128xf32>
    %cst_25 = arith.constant dense<0.000000e+00> : vector<8x128xf32>
    %39 = tpu.matmul %27, %17, %cst_25 {dimension_numbers = #tpu.dot_dimension_numbers<[1], [0], [0], [1], [0, 0, 1, 1], [], []>} : vector<8x4xf32>, vector<4x128xf32>, vector<8x128xf32> -> vector<8x128xf32>
    %40 = arith.addf %38, %39 : vector<8x128xf32>
    %cst_26 = arith.constant dense<0.000000e+00> : vector<8x128xf32>
    %41 = tpu.matmul %29, %23, %cst_26 {dimension_numbers = #tpu.dot_dimension_numbers<[1], [0], [0], [1], [0, 0, 1, 1], [], []>} : vector<8x4xf32>, vector<4x128xf32>, vector<8x128xf32> -> vector<8x128xf32>
    %42 = arith.addf %40, %41 : vector<8x128xf32>
    %43 = vector.broadcast %30 : vector<8x1xf32> to vector<8x128xf32>
    %44 = arith.addf %42, %43 : vector<8x128xf32>
    %c0_27 = arith.constant 0 : index
    %c0_28 = arith.constant 0 : index
    %45 = vector.load %arg16[%c0_27, %c0_28] : memref<8x128xf32, #tpu.memory_space<vmem>>, vector<8x128xf32>
    tpu.vector_store %arg16[%c0_27, %c0_28], %37 {strides = array<i32>} : memref<8x128xf32, #tpu.memory_space<vmem>>, vector<8x128xf32>,
    %c0_29 = arith.constant 0 : index
    %c0_30 = arith.constant 0 : index
    %46 = vector.load %arg17[%c0_29, %c0_30] : memref<8x128xf32, #tpu.memory_space<vmem>>, vector<8x128xf32>
    tpu.vector_store %arg17[%c0_29, %c0_30], %44 {strides = array<i32>} : memref<8x128xf32, #tpu.memory_space<vmem>>, vector<8x128xf32>,
    %c0_31 = arith.constant 0 : index
    %c0_32 = arith.constant 0 : index
    %47 = vector.load %arg9[%c0_31, %c0_32] : memref<8x1xf32, #tpu.memory_space<vmem>>, vector<8x1xf32>
    %c0_33 = arith.constant 0 : index
    %c0_34 = arith.constant 0 : index
    %48 = vector.load %arg10[%c0_33, %c0_34] : memref<8x1xf32, #tpu.memory_space<vmem>>, vector<8x1xf32>
    %49 = vector.broadcast %47 : vector<8x1xf32> to vector<8x128xf32>
    %50 = arith.mulf %37, %49 : vector<8x128xf32>
    %51 = vector.broadcast %48 : vector<8x1xf32> to vector<8x128xf32>
    %52 = arith.addf %50, %51 : vector<8x128xf32>
    %cst_35 = arith.constant 0.000000e+00 : f32
    %53 = vector.broadcast %cst_35 : f32 to vector<8x128xf32>
    %54 = arith.maximumf %52, %53 : vector<8x128xf32>
    %55 = vector.broadcast %47 : vector<8x1xf32> to vector<8x128xf32>
    %56 = arith.mulf %44, %55 : vector<8x128xf32>
    %57 = vector.broadcast %48 : vector<8x1xf32> to vector<8x128xf32>
    %58 = arith.addf %56, %57 : vector<8x128xf32>
    %cst_36 = arith.constant 0.000000e+00 : f32
    %59 = vector.broadcast %cst_36 : f32 to vector<8x128xf32>
    %60 = arith.maximumf %58, %59 : vector<8x128xf32>
    %c1_i32_37 = arith.constant 1 : i32
    %61 = tpu.dynamic_rotate %60 by %c1_i32_37 dim 1 : vector<8x128xf32>, i32 -> vector<8x128xf32>
    %62 = vector.broadcast %0 : vector<1x128xf32> to vector<8x128xf32>
    %63 = arith.mulf %61, %62 : vector<8x128xf32>
    %c0_38 = arith.constant 0 : index
    %c0_39 = arith.constant 0 : index
    %c0_40 = arith.constant 0 : index
    %64 = vector.load %arg11[%c0_38, %c0_39, %c0_40] : memref<3x8x8xf32, #tpu.memory_space<vmem>>, vector<1x8x8xf32>
    %65 = vector.shape_cast %64 : vector<1x8x8xf32> to vector<8x8xf32>
    %c1_41 = arith.constant 1 : index
    %c0_42 = arith.constant 0 : index
    %c0_43 = arith.constant 0 : index
    %66 = vector.load %arg11[%c1_41, %c0_42, %c0_43] : memref<3x8x8xf32, #tpu.memory_space<vmem>>, vector<1x8x8xf32>
    %67 = vector.shape_cast %66 : vector<1x8x8xf32> to vector<8x8xf32>
    %c2_44 = arith.constant 2 : index
    %c0_45 = arith.constant 0 : index
    %c0_46 = arith.constant 0 : index
    %68 = vector.load %arg11[%c2_44, %c0_45, %c0_46] : memref<3x8x8xf32, #tpu.memory_space<vmem>>, vector<1x8x8xf32>
    %69 = vector.shape_cast %68 : vector<1x8x8xf32> to vector<8x8xf32>
    %cst_47 = arith.constant dense<0.000000e+00> : vector<8x128xf32>
    %70 = tpu.matmul %65, %63, %cst_47 {dimension_numbers = #tpu.dot_dimension_numbers<[1], [0], [0], [1], [0, 0, 1, 1], [], []>} : vector<8x8xf32>, vector<8x128xf32>, vector<8x128xf32> -> vector<8x128xf32>
    %cst_48 = arith.constant dense<0.000000e+00> : vector<8x128xf32>
    %71 = tpu.matmul %67, %54, %cst_48 {dimension_numbers = #tpu.dot_dimension_numbers<[1], [0], [0], [1], [0, 0, 1, 1], [], []>} : vector<8x8xf32>, vector<8x128xf32>, vector<8x128xf32> -> vector<8x128xf32>
    %72 = arith.addf %70, %71 : vector<8x128xf32>
    %cst_49 = arith.constant dense<0.000000e+00> : vector<8x128xf32>
    %73 = tpu.matmul %69, %60, %cst_49 {dimension_numbers = #tpu.dot_dimension_numbers<[1], [0], [0], [1], [0, 0, 1, 1], [], []>} : vector<8x8xf32>, vector<8x128xf32>, vector<8x128xf32> -> vector<8x128xf32>
    %74 = arith.addf %72, %73 : vector<8x128xf32>
    %c0_50 = arith.constant 0 : index
    %c0_51 = arith.constant 0 : index
    %75 = vector.load %arg12[%c0_50, %c0_51] : memref<8x1xf32, #tpu.memory_space<vmem>>, vector<8x1xf32>
    %76 = vector.broadcast %75 : vector<8x1xf32> to vector<8x128xf32>
    %77 = arith.addf %74, %76 : vector<8x128xf32>
    %c0_52 = arith.constant 0 : index
    %c0_53 = arith.constant 0 : index
    %78 = vector.load %arg13[%c0_52, %c0_53] : memref<8x4xf32, #tpu.memory_space<vmem>>, vector<8x4xf32>
    %c0_54 = arith.constant 0 : index
    %c0_55 = arith.constant 0 : index
    %79 = vector.load %arg1[%c0_54, %c0_55] : memref<4x128xf32, #tpu.memory_space<vmem>>, vector<4x128xf32>
    %cst_56 = arith.constant dense<0.000000e+00> : vector<8x128xf32>
    %80 = tpu.matmul %78, %79, %cst_56 {dimension_numbers = #tpu.dot_dimension_numbers<[1], [0], [0], [1], [0, 0, 1, 1], [], []>} : vector<8x4xf32>, vector<4x128xf32>, vector<8x128xf32> -> vector<8x128xf32>
    %c0_57 = arith.constant 0 : index
    %c0_58 = arith.constant 0 : index
    %81 = vector.load %arg14[%c0_57, %c0_58] : memref<8x1xf32, #tpu.memory_space<vmem>>, vector<8x1xf32>
    %82 = vector.broadcast %81 : vector<8x1xf32> to vector<8x128xf32>
    %83 = arith.addf %80, %82 : vector<8x128xf32>
    %84 = arith.addf %83, %77 : vector<8x128xf32>
    %c0_59 = arith.constant 0 : index
    %c0_60 = arith.constant 0 : index
    %85 = vector.load %arg15[%c0_59, %c0_60] : memref<8x128xf32, #tpu.memory_space<vmem>>, vector<8x128xf32>
    tpu.vector_store %arg15[%c0_59, %c0_60], %84 {strides = array<i32>} : memref<8x128xf32, #tpu.memory_space<vmem>>, vector<8x128xf32>,
    return
  }
  func.func @transform_0(%arg0: i32) -> (i32, i32) {
    %c0_i32 = arith.constant 0 : i32
    %c0_i32_0 = arith.constant 0 : i32
    return %c0_i32, %arg0 : i32, i32
  }
  func.func @transform_1(%arg0: i32) -> (i32, i32) {
    %c0_i32 = arith.constant 0 : i32
    %c0_i32_0 = arith.constant 0 : i32
    return %c0_i32, %arg0 : i32, i32
  }
  func.func @transform_2(%arg0: i32) -> (i32, i32) {
    %c0_i32 = arith.constant 0 : i32
    %c0_i32_0 = arith.constant 0 : i32
    %c0_i32_1 = arith.constant 0 : i32
    return %c0_i32, %c0_i32_0 : i32, i32
  }
  func.func @transform_3(%arg0: i32) -> (i32, i32) {
    %c0_i32 = arith.constant 0 : i32
    %c0_i32_0 = arith.constant 0 : i32
    %c0_i32_1 = arith.constant 0 : i32
    return %c0_i32, %c0_i32_0 : i32, i32
  }
  func.func @transform_4(%arg0: i32) -> (i32, i32) {
    %c0_i32 = arith.constant 0 : i32
    %c0_i32_0 = arith.constant 0 : i32
    %c0_i32_1 = arith.constant 0 : i32
    return %c0_i32, %c0_i32_0 : i32, i32
  }
  func.func @transform_5(%arg0: i32) -> (i32, i32) {
    %c0_i32 = arith.constant 0 : i32
    %c0_i32_0 = arith.constant 0 : i32
    %c0_i32_1 = arith.constant 0 : i32
    return %c0_i32, %c0_i32_0 : i32, i32
  }
  func.func @transform_6(%arg0: i32) -> (i32, i32, i32) {
    %c0_i32 = arith.constant 0 : i32
    %c0_i32_0 = arith.constant 0 : i32
    %c0_i32_1 = arith.constant 0 : i32
    %c0_i32_2 = arith.constant 0 : i32
    return %c0_i32, %c0_i32_0, %c0_i32_1 : i32, i32, i32
  }
  func.func @transform_7(%arg0: i32) -> (i32, i32) {
    %c0_i32 = arith.constant 0 : i32
    %c0_i32_0 = arith.constant 0 : i32
    %c0_i32_1 = arith.constant 0 : i32
    return %c0_i32, %c0_i32_0 : i32, i32
  }
  func.func @transform_8(%arg0: i32) -> (i32, i32) {
    %c0_i32 = arith.constant 0 : i32
    %c0_i32_0 = arith.constant 0 : i32
    %c0_i32_1 = arith.constant 0 : i32
    return %c0_i32, %c0_i32_0 : i32, i32
  }
  func.func @transform_9(%arg0: i32) -> (i32, i32) {
    %c0_i32 = arith.constant 0 : i32
    %c0_i32_0 = arith.constant 0 : i32
    %c0_i32_1 = arith.constant 0 : i32
    return %c0_i32, %c0_i32_0 : i32, i32
  }
  func.func @transform_10(%arg0: i32) -> (i32, i32, i32) {
    %c0_i32 = arith.constant 0 : i32
    %c0_i32_0 = arith.constant 0 : i32
    %c0_i32_1 = arith.constant 0 : i32
    %c0_i32_2 = arith.constant 0 : i32
    return %c0_i32, %c0_i32_0, %c0_i32_1 : i32, i32, i32
  }
  func.func @transform_11(%arg0: i32) -> (i32, i32) {
    %c0_i32 = arith.constant 0 : i32
    %c0_i32_0 = arith.constant 0 : i32
    %c0_i32_1 = arith.constant 0 : i32
    return %c0_i32, %c0_i32_0 : i32, i32
  }
  func.func @transform_12(%arg0: i32) -> (i32, i32) {
    %c0_i32 = arith.constant 0 : i32
    %c0_i32_0 = arith.constant 0 : i32
    %c0_i32_1 = arith.constant 0 : i32
    return %c0_i32, %c0_i32_0 : i32, i32
  }
  func.func @transform_13(%arg0: i32) -> (i32, i32) {
    %c0_i32 = arith.constant 0 : i32
    %c0_i32_0 = arith.constant 0 : i32
    %c0_i32_1 = arith.constant 0 : i32
    return %c0_i32, %c0_i32_0 : i32, i32
  }
  func.func @transform_14(%arg0: i32) -> (i32, i32) {
    %c0_i32 = arith.constant 0 : i32
    %c0_i32_0 = arith.constant 0 : i32
    return %c0_i32, %arg0 : i32, i32
  }
  func.func @transform_15(%arg0: i32) -> (i32, i32) {
    %c0_i32 = arith.constant 0 : i32
    %c0_i32_0 = arith.constant 0 : i32
    return %c0_i32, %arg0 : i32, i32
  }
  func.func @transform_16(%arg0: i32) -> (i32, i32) {
    %c0_i32 = arith.constant 0 : i32
    %c0_i32_0 = arith.constant 0 : i32
    return %c0_i32, %arg0 : i32, i32
  }
}

</mosaic_0001>

<bundles_post_ra>
// kernel: tpu_custom_call.1
= control target key start
LH: loop header
LB: loop body
LE: loop exit
PB: predicated region body
PF: predicated region fallthrough
CT: control target
= control target key end

     0   :  { %s2248_s0 = inlined_call_operand.vmem [shape: f32[4,256], index: 0, kind: input, shape index: {}]   ;;  %s2249_s1 = inlined_call_operand.vmem [shape: f32[4,256], index: 1, kind: input, shape index: {}]   ;;  %s2250_s2 = inlined_call_operand.vmem [shape: f32[1,128], index: 2, kind: input, shape index: {}]   ;;  %s2251_s3 = inlined_call_operand.vmem [shape: f32[1,128], index: 3, kind: input, shape index: {}]   ;;  %s2252_s4 = inlined_call_operand.vmem [shape: f32[4,1], index: 4, kind: input, shape index: {}]   ;;  %s2253_s5 = inlined_call_operand.vmem [shape: f32[4,1], index: 5, kind: input, shape index: {}]   ;;  %s2254_s6 = inlined_call_operand.vmem [shape: f32[3,8,4], index: 6, kind: input, shape index: {}]   ;;  %s2255_s7 = inlined_call_operand.vmem [shape: f32[8,1], index: 7, kind: input, shape index: {}]   ;;  %s2256_s8 = inlined_call_operand.vmem [shape: f32[8,1], index: 8, kind: input, shape index: {}]   ;;  %s2257_s9 = inlined_call_operand.vmem [shape: f32[8,1], index: 9, kind: input, shape index: {}]   ;;  %s2258_s10 = inlined_call_operand.vmem [shape: f32[3,8,8], index: 10, kind: input, shape index: {}]   ;;  %s2259_s11 = inlined_call_operand.vmem [shape: f32[8,1], index: 11, kind: input, shape index: {}]   ;;  %s2260_s12 = inlined_call_operand.vmem [shape: f32[8,4], index: 12, kind: input, shape index: {}]   ;;  %s2261_s13 = inlined_call_operand.vmem [shape: f32[8,1], index: 13, kind: input, shape index: {}]   ;;  %s2262_s14 = inlined_call_operand.hbm [shape: f32[8,256], index: 14, kind: output, shape index: {0}]   ;;  %s2263_s15 = inlined_call_operand.hbm [shape: f32[8,256], index: 15, kind: output, shape index: {1}]   ;;  %s2264_s16 = inlined_call_operand.hbm [shape: f32[8,256], index: 16, kind: output, shape index: {2}]  }
   0x1   :  { %2268 = sst [smem:[#allocation9_spill]] %s2248_s0 }
   0x2   :  { %2269 = sst [smem:[#allocation10_spill]] %s2249_s1 }
   0x3   :  { %2270 = sst [smem:[#allocation11_spill]] %s2250_s2 }
   0x4   :  { %2271 = sst [smem:[#allocation12_spill]] %s2251_s3 }
   0x5   :  { %2272 = sst [smem:[#allocation13_spill]] %s2252_s4 }
   0x6   :  { %2273 = sst [smem:[#allocation14_spill]] %s2253_s5 }
   0x7   :  { %2274 = sst [smem:[#allocation15_spill]] %s2255_s7 }
   0x8   :  { %2275 = sst [smem:[#allocation16_spill]] %s2257_s9 }
   0x9   :  { %22 = vsyncpa [#allocation3], 0 }
   0xa   :  { %24 = vsyncpa [#allocation3 + $0x1], 0 }
   0xb   :  { %25 = vsyncpa [#allocation5], 0 }
   0xc   :  { %27 = vsyncpa [#allocation5 + $0x1], 0  ;;  %s1965_s21 = smov 0   ;;  %s1967_s22 = smov 0  }
   0xd   :  { %s1969_s23 = smov 0   ;;  %s1971_s24 = smov 0  }
   0xe LB: > { %s1986_s25 = sadd.s32 4294967295, %s1870_s24   ;;  %s2265_s26 = sadd.s32 4294967294, %s1870_s24   ;;  %s1870_s24 = sphi %s1971_s24, %s2292_s24   ;;  %s1866_s23 = sphi %s1969_s23, %s2291_s23   ;;  %s1862_s22 = sphi %s1967_s22, %s2290_s22   ;;  %s1858_s21 = sphi %s1965_s21, %s2289_s21  }
   0xf   : > { %s1990_s27 = sadd.s32 1, %s1870_s24   ;;  %s344_s28 = sadd.s32 1, %s1866_s23 }
  0x10   : > { %s341_s29 = ssub.s32 %s1870_s24, %s1990_s27  ;;  %p354_p0 = scmp.ne.s32.totalorder %s1866_s23, %s1862_s22 }
  0x11   : > { %p342_p1 = scmp.eq.s32.totalorder %s341_s29, 0  ;;  %p355_p2 = scmp.eq.s32.totalorder %s1986_s25, 1 }
  0x12   : > { %p360_p3 = scmp.ne.s32.totalorder %s1862_s22, %s1858_s21  ;;  %p361_p4 = scmp.eq.s32.totalorder %s2265_s26, 1 }
  0x13   : > { %s2003_s30 = scalar_select %p342_p1, %s1866_s23, %s344_s28  }
  0x14   : > { %p2005_p5 = por %p355_p2, %p354_p0  ;;  %p2009_p6 = por %p361_p4, %p360_p3 }
  0x15   : > { %p1577_p7 = scmp.ge.s32.totalorder %s1870_s24, 1  ;;  %p481_p8 = scmp.lt.s32.totalorder %s1870_s24, 3 }
  0x17   : > { %p482_p9 = pnand %p1577_p7, %p481_p8 }
  0x18   : > { %s2278_s4 = sld [smem:[#allocation13_spill]] (!%p482_p9)  ;;  %v1872_v1 = vmov (!%p482_p9), 0   ;;  %s2279_s5 = sld [smem:[#allocation14_spill]] (!%p482_p9)  ;;  %v1873_v4 = vmov (!%p482_p9), 0.0   ;;  %v1299_v6 = vld [vmem:[%s2259_s11] sm:$0xff] (!%p482_p9)  ;;  %vm1874_vm0 = vmmov (!%p482_p9), 0  }
  0x19   : > { %485 = sbr.rel (%p482_p9) target bundleno = 881 (0x371), region = 76  ;;  %1746 = vset.pattern.permute.xlu0 (!%p482_p9), %v1872_v1  ;;  %1747 = vset.pattern.permute.xlu1 (!%p482_p9), %v1872_v1  ;;  %s2280_s7 = sld [smem:[#allocation15_spill]] (!%p482_p9)  ;;  %vm602_vm1 = vcmask (!%p482_p9), 1043456   ;;  %v1585_v17 = vld [vmem:[%s2254_s6 + $0x8] sm:$0xff] (!%p482_p9)  ;;  %vm598_vm2 = vcmask (!%p482_p9), 31744   ;;  %v592_v18 = vld [vmem:[%s2254_s6] sm:$0xff] (!%p482_p9) }
  0x1a   : > { %1634 = vmatprep.subr.mxu1 (!%p482_p9), %v1873_v4  ;;  %1654 = vmatprep.subr.mxu0 (!%p482_p9), %v1873_v4  ;;  %s2281_s9 = sld [smem:[#allocation16_spill]] (!%p482_p9)  ;;  %p544_p10 = scmp.lt.s32.totalorder (!%p482_p9), %s1986_s25, 1  ;;  %v1052_v19 = vld [vmem:[%s2256_s8] sm:$0xff] (!%p482_p9)  ;;  %v1586_v23 = vld [vmem:[%s2254_s6 + $0x10] sm:$0xff] (!%p482_p9)  ;;  %v1599_v50 = vld [vmem:[%s2258_s10 + $0x8] sm:$0xff] (!%p482_p9)  ;;  %vm1078_vm3 = vcmask (!%p482_p9), 64512  }
  0x1b   : > { %1636 = vmatprep.mubr.msk.f32.mxu1 (!%p482_p9), %vm1874_vm0, %v1873_v4  ;;  %1656 = vmatprep.mubr.msk.f32.mxu0 (!%p482_p9), %vm1874_vm0, %v1873_v4  ;;  %s2282_s18 = sld [smem:[#allocation9_spill]] (!%p482_p9)  ;;  %s2283_s1 = sld [smem:[#allocation10_spill]] (!%p482_p9)  ;;  %v1308_v55 = vld [vmem:[%s2261_s13] sm:$0xff] (!%p482_p9)  ;;  %v1600_v59 = vld [vmem:[%s2258_s10 + $0x10] sm:$0xff] (!%p482_p9) }
  0x1c   : > { %s2284_s2 = sld [smem:[#allocation11_spill]] (!%p482_p9)  ;;  %s2285_s3 = sld [smem:[#allocation12_spill]] (!%p482_p9)  ;;  %v1073_v58 = vld [vmem:[%s2258_s10] sm:$0xff] (!%p482_p9) }
  0x1d   : > { %s2266_s29 = sand.u32 (!%p482_p9), 1, %s1862_s22   ;;  %v1306_v61 = vld [vmem:[%s2260_s12] sm:$0xff] (!%p482_p9) }
  0x1e   : > { %v554_v0 = vld [vmem:[%s2278_s4] sm:$0xf] (!%p482_p9) }
  0x1f   : > { %559 = vperm.xlu0 (!%p482_p9), %1746, %v554_v0   ;;  %v555_v2 = vld [vmem:[%s2279_s5] sm:$0xf] (!%p482_p9)  ;;  %s1397_s5 = sand.u32 (!%p482_p9), 1, %s1986_s25  }
  0x20   : > { %v597_v3 = vld [vmem:[%s2280_s7] sm:$0xff]  ;;  %s545_s26 = scalar_select %p544_p10, %s1986_s25, 1 }
  0x21   : > { %v1053_v5 = vld [vmem:[%s2281_s9] sm:$0xff] }
  0x22   : > { %s1581_s28 = sshll.u32 %s545_s26, 2  ;;  %s1875_s26 = smov 1   ;;  %v2070_v20 = vld [vmem:[%s2284_s2] ss:$0 sm:$0xff] }
  0x23   : > { %565 = vperm.xlu0 %1746, %v555_v2   ;;  %s2041_s19 = scalar_lea.vmem %s2282_s18, %s1581_s28  ;;  %s551_s4 = scalar_lea.vmem %s2283_s1, %s1581_s28  ;;  %v1584_v24 = vld [vmem:[%s2285_s3] ss:$0 sm:$0xff] }
  0x24   : > { %v556_v8 = vld [vmem:[%s2041_s19] sm:$0xf]  ;;  %s1876_s28 = smov 127   ;;  %s2099_s18 = sshll.u32 %s2266_s29, 3 }
  0x25   : > { %v570_v9 = vld [vmem:[%s551_s4] sm:$0xf]  ;;  %s536_s4 = scalar_lea.vmem [#allocation4], %s2099_s18  ;;  %s2267_s7 = scalar_lea.vmem [#allocation6], %s2099_s18 }
  0x26   : > { %v1307_v60 = vld [vmem:[%s2041_s19] sm:$0xf]  ;;  %s2141_s29 = sshll.u32 %s1986_s25, 7  ;;  %s2151_s1 = scalar_lea.sflag [#allocation5], %s1397_s5 }
  0x27   : > { %831 = vperm.xlu0 %1746, %v597_v3   ;;  %s2147_s19 = scalar_lea.hbm %s2263_s15, %s2141_s29 }
  0x2b   : > { %1062 = vperm.xlu0 %1746, %v1053_v5  }
  0x2f   : > { %1302 = vperm.xlu0 %1746, %v1299_v6  }
  0x9e   : > { %v560_v7 = vpop.permute.xlu0 %559 }
  0x9f   : > { %v562_v10 = vmul.f32 %v560_v7, %v556_v8  ;;  %v571_v11 = vmul.f32 %v570_v9, %v560_v7 }
  0xa2   : > { %v566_v12 = vpop.permute.xlu0 %565 }
  0xa3   : > { %v568_v13 = vadd.f32 %v566_v12, %v562_v10  ;;  %v572_v14 = vadd.f32 %v571_v11, %v566_v12 }
  0xa5   : > { %v569_v15 = vmax.f32 %v568_v13, 0.0  ;;  %v573_v16 = vmax.f32 %v572_v14, 0.0 }
  0xa6   : > { %v832_v34 = vpop.permute.xlu0 %831 }
  0xa7   : > { %574 = vrot.lane.b32.xlu1 %v573_v16, %s1875_s26  ;;  %1635 = vmatpush3.msk.msra.mxu1 %vm602_vm1, %v569_v15 }
  0xa8   : > { %1655 = vmatpush3.msk.msra.mxu0 %vm602_vm1, %v569_v15  ;;  %1637 = vmatmul.mubr.msk.f32.vlgmr.msra.gmra.mrb[0].mxu1 %vm598_vm2, %v1585_v17 }
  0xa9   : > { %1639 = vmatprep.subr.mxu1 %v1873_v4  ;;  %1641 = vmatprep.mubr.msk.f32.mxu1 %vm1874_vm0, %v1873_v4 }
  0xaa   : > { %1657 = vmatmul.mubr.msk.f32.vlgmr.msra.gmra.mrb[0].mxu0 %vm598_vm2, %v592_v18  ;;  %1664 = vmatprep.subr.mxu0 %v1873_v4  ;;  %v1063_v44 = vpop.permute.xlu0 %1062 }
  0xab   : > { %583 = vrot.lane.b32.xlu1 %v569_v15, %s1876_s28  ;;  %1666 = vmatprep.mubr.msk.f32.mxu0 %vm1874_vm0, %v1873_v4  ;;  %s1877_s28 = smov [#allocation4]  }
  0xac   : > { %s1752_s20 = sshll.u32 %s1877_s28, 4  ;;  %s1753_s20 = int_to_ptr.vmem [resolvable:$false] %s1752_s20 }
  0xad   : > { %s1754_s25 = scalar_lea.vmem %s1753_s20, 256 }
  0xaf   : > { %1056 = vperm.xlu1 %1747, %v1052_v19  }
 0x119   : > { %v575_v21 = vpop.permute.xlu1 %574 }
 0x11a   : > { %v582_v22 = vmul.f32 %v2070_v20, %v575_v21 }
 0x11c   : > { %1640 = vmatpush3.msk.msra.mxu1 %vm602_vm1, %v582_v22 }
 0x11d   : > { %1642 = vmatmul.mubr.msk.f32.vlgmr.msra.gmra.mrb[2].mxu1 %vm598_vm2, %v592_v18  ;;  %1644 = vmatprep.subr.mxu1 %v1873_v4  ;;  %v584_v25 = vpop.permute.xlu1 %583 }
 0x11e   : > { %1645 = vmatpush3.msk.msra.mxu1 %vm602_vm1, %v573_v16  ;;  %1646 = vmatprep.mubr.msk.f32.mxu1 %vm1874_vm0, %v1873_v4  ;;  %v591_v26 = vmul.f32 %v1584_v24, %v584_v25 }
 0x11f   : > { %1649 = vmatprep.subr.mxu1 %v1873_v4 }
 0x121   : > { %1647 = vmatmul.mubr.msk.f32.vlgmr.msra.gmra.mrb[4].mxu1 %vm598_vm2, %v1586_v23 }
 0x122   : > { %1650 = vmatpush3.msk.msra.mxu1 %vm602_vm1, %v573_v16  ;;  %1651 = vmatprep.mubr.msk.f32.mxu1 %vm1874_vm0, %v1873_v4 }
 0x123   : > { %1659 = vmatprep.subr.mxu1 %v1873_v4 }
 0x125   : > { %1652 = vmatmul.mubr.msk.f32.vlgmr.msra.gmra.mrb[6].mxu1 %vm598_vm2, %v1585_v17 }
 0x126   : > { %1660 = vmatpush3.msk.msra.mxu1 %vm602_vm1, %v591_v26  ;;  %1661 = vmatprep.mubr.msk.f32.mxu1 %vm1874_vm0, %v1873_v4 }
 0x129   : > { %1662 = vmatmul.mubr.msk.f32.vlgmr.msra.gmra.mrb[8].mxu1 %vm598_vm2, %v1586_v23 }
 0x12e   : > { %v1057_v38 = vpop.permute.xlu1 %1056 }
 0x17b   : > { %v672_v27 = vpop.f32.mrb[0].mxu1 }
 0x17c   : > { %v1638_v28 = vpop.f32.mrb[1].mxu1 }
 0x17d   : > { %v971_v29 = vpop.f32.mrb[0].mxu0 }
 0x17e   : > { %v1658_v30 = vpop.f32.mrb[1].mxu0 }
 0x1f0   : > { %v748_v31 = vpop.f32.mrb[2].mxu1 }
 0x1f1   : > { %v749_v32 = vadd.f32 %v748_v31, %v672_v27  ;;  %v1643_v33 = vpop.f32.mrb[3].mxu1 }
 0x1f4   : > { %v824_v35 = vpop.f32.mrb[4].mxu1 }
 0x1f5   : > { %v828_v36 = vadd.f32 %v824_v35, %v749_v32  ;;  %v1648_v37 = vpop.f32.mrb[5].mxu1 }
 0x1f7   : > { %v834_v39 = vadd.f32 %v832_v34, %v828_v36 }
 0x1f8   : > { %v901_v40 = vpop.f32.mrb[6].mxu1 }
 0x1f9   : > { %v1059_v41 = vmul.f32 %v1057_v38, %v834_v39  ;;  %v972_v42 = vadd.f32 %v971_v29, %v901_v40  ;;  %v1653_v43 = vpop.f32.mrb[7].mxu1  ;;  %1050 = vst [vmem:[%s536_s4] sm:$0xff] %v834_v39 }
 0x1fb   : > { %v1065_v45 = vadd.f32 %v1063_v44, %v1059_v41 }
 0x1fc   : > { %v1044_v46 = vpop.f32.mrb[8].mxu1 }
 0x1fd   : > { %v1066_v47 = vmax.f32 %v1065_v45, 0.0  ;;  %v1048_v48 = vadd.f32 %v1044_v46, %v972_v42  ;;  %v1663_v49 = vpop.f32.mrb[9].mxu1 }
 0x1ff   : > { %v1049_v51 = vadd.f32 %v1048_v48, %v832_v34  ;;  %1665 = vmatpush3.msra.mxu0 %v1066_v47 }
 0x200   : > { %1667 = vmatmul.mubr.msk.f32.vlgmr.msra.gmra.mrb[2].mxu0 %vm1078_vm3, %v1599_v50  ;;  %1669 = vmatprep.subr.mxu0 %v1873_v4 }
 0x201   : > { %1051 = vst [vmem:[%s2267_s7] sm:$0xff] %v1049_v51  ;;  %v1067_v52 = vmul.f32 %v1057_v38, %v1049_v51  ;;  %1671 = vmatprep.mubr.msk.f32.mxu0 %vm1874_vm0, %v1873_v4  ;;  %s1429_s7 = sshll.u32 %s536_s4, 4  ;;  %s1430_s7 = int_to_ptr.vmem [resolvable:$true] %s1429_s7 }
 0x202   : > { %s1748_s2 = scalar_lea.vmem %s1430_s7, 128  ;;  %p1755_p0 = scmp.lt.s32.totalorder %s1430_s7, %s1753_s20 }
 0x203   : > { %v1068_v53 = vadd.f32 %v1067_v52, %v1063_v44  ;;  %p1749_p11 = scmp.ne.s32.totalorder %s1430_s7, %s1748_s2  ;;  %p1756_p1 = scmp.lt.s32.totalorder %s1754_s25, %s1748_s2 }
 0x205   : > { %v1069_v54 = vmax.f32 %v1068_v53, 0.0  ;;  %p1750_p12 = pnand %p1749_p11, %p2005_p5  ;;  %p1757_p2 = por %p1756_p1, %p1755_p0 }
 0x207   : > { %1070 = vrot.lane.b32.xlu1 %v1069_v54, %s1875_s26  ;;  %p1751_p13 = pneg %p1750_p12 }
 0x209   : > { %p1758_p3 = pnand %p1757_p2, %p1751_p13 }
 0x20b   : > { %1311 = vperm.xlu1 %1747, %v1308_v55  }
 0x279   : > { %v1071_v56 = vpop.permute.xlu1 %1070 }
 0x27a   : > { %v1072_v57 = vmul.f32 %v2070_v20, %v1071_v56 }
 0x27c   : > { %1670 = vmatpush3.msra.mxu0 %v1072_v57 }
 0x27d   : > { %1672 = vmatmul.mubr.msk.f32.vlgmr.msra.gmra.mrb[2].mxu0 %vm1078_vm3, %v1073_v58  ;;  %1674 = vmatprep.subr.mxu0 %v1873_v4 }
 0x27e   : > { %1675 = vmatpush3.msra.mxu0 %v1069_v54  ;;  %1676 = vmatprep.mubr.msk.f32.mxu0 %vm1874_vm0, %v1873_v4 }
 0x27f   : > { %1679 = vmatprep.subr.mxu0 %v1873_v4 }
 0x285   : > { %1677 = vmatmul.mubr.msk.f32.vlgmr.msra.gmra.mrb[2].mxu0 %vm1078_vm3, %v1600_v59 }
 0x286   : > { %1680 = vmatpush3.msk.msra.mxu0 %vm602_vm1, %v1307_v60  ;;  %1681 = vmatprep.mubr.msk.f32.mxu0 %vm1874_vm0, %v1873_v4 }
 0x28d   : > { %1682 = vmatmul.mubr.msk.f32.vlgmr.msra.gmra.mrb[2].mxu0 %vm598_vm2, %v1306_v61 }
 0x28e   : > { %1761 = shalt.err (!%p1758_p3)
}
 0x28f   : > { %s1762_s4 = scalar_lea.hbm %s2147_s19, 128  ;;  %s1766_s9 = scalar_lea.hbm %s2263_s15, 256 }
 0x290   : > { %p1763_p4 = scmp.ne.s32.totalorder %s2147_s19, %s1762_s4  ;;  %p1767_p9 = scmp.lt.u32.totalorder %s2147_s19, %s2263_s15 }
 0x291   : > { %p1768_p10 = scmp.lt.u32.totalorder %s1766_s9, %s1762_s4  ;;  %p1770_p12 = scmp.lt.u32.totalorder %s1762_s4, %s2147_s19 }
 0x292   : > { %p1764_p7 = pnand %p1763_p4, %p2005_p5 }
 0x293   : > { %p1769_p11 = por %p1768_p10, %p1767_p9 }
 0x294   : > { %p1765_p8 = pneg %p1764_p7 }
 0x295   : > { %p1771_p13 = por %p1770_p12, %p1769_p11 }
 0x297   : > { %p1772_p0 = pnand %p1771_p13, %p1765_p8 }
 0x299   : > { %1775 = shalt.err (!%p1772_p0)
}
 0x29a   : > { %1693 = dma.vmem_to_hbm [thread:$0]  (%p2005_p5), %s1430_s7, 128, %s2147_s19, %s2151_s1  }
 0x29b   : > { %s2175_s5 = scalar_lea.hbm %s2264_s16, %s2141_s29  ;;  %s2286_s26 = scalar_lea.vmem [#allocation6], %s2099_s18 }
 0x29c   : > { %s1442_s9 = sshll.u32 %s2286_s26, 4  ;;  %s1878_s28 = smov [#allocation6]   ;;  %s1443_s9 = int_to_ptr.vmem [resolvable:$true] %s1442_s9 }
 0x29d   : > { %s1776_s4 = scalar_lea.vmem %s1443_s9, 128  ;;  %s1780_s20 = sshll.u32 %s1878_s28, 4  ;;  %s1781_s20 = int_to_ptr.vmem [resolvable:$false] %s1780_s20 }
 0x29e   : > { %p1777_p1 = scmp.ne.s32.totalorder %s1443_s9, %s1776_s4  ;;  %s1782_s3 = scalar_lea.vmem %s1781_s20, 256 }
 0x29f   : > { %p1783_p4 = scmp.lt.s32.totalorder %s1443_s9, %s1781_s20  ;;  %p1784_p7 = scmp.lt.s32.totalorder %s1782_s3, %s1776_s4 }
 0x2a0   : > { %p1778_p2 = pnand %p1777_p1, %p2005_p5 }
 0x2a1   : > { %p1785_p8 = por %p1784_p7, %p1783_p4 }
 0x2a2   : > { %p1779_p3 = pneg %p1778_p2 }
 0x2a4   : > { %p1786_p9 = pnand %p1785_p8, %p1779_p3 }
 0x2a6   : > { %1789 = shalt.err (!%p1786_p9)
}
 0x2a7   : > { %s1790_s7 = scalar_lea.hbm %s2175_s5, 128  ;;  %s1794_s25 = scalar_lea.hbm %s2264_s16, 256 }
 0x2a8   : > { %p1791_p10 = scmp.ne.s32.totalorder %s2175_s5, %s1790_s7  ;;  %p1795_p13 = scmp.lt.u32.totalorder %s2175_s5, %s2264_s16 }
 0x2a9   : > { %p1796_p0 = scmp.lt.u32.totalorder %s1794_s25, %s1790_s7  ;;  %p1798_p2 = scmp.lt.u32.totalorder %s1790_s7, %s2175_s5 }
 0x2aa   : > { %p1792_p11 = pnand %p1791_p10, %p2005_p5 }
 0x2ab   : > { %p1797_p1 = por %p1796_p0, %p1795_p13 }
 0x2ac   : > { %p1793_p12 = pneg %p1792_p11 }
 0x2ad   : > { %p1799_p3 = por %p1798_p2, %p1797_p1 }
 0x2af   : > { %p1800_p4 = pnand %p1799_p3, %p1793_p12 }
 0x2b1   : > { %1803 = shalt.err (!%p1800_p4)
}
 0x2b2   : > { %1694 = dma.vmem_to_hbm [thread:$0]  (%p2005_p5), %s1443_s9, 128, %s2175_s5, %s2151_s1   ;;  %v1312_v62 = vpop.permute.xlu1 %1311  ;;  %v1303_v63 = vpop.permute.xlu0 %1302 }
 0x2b3   : > { %s529_s3 = scalar_lea.vmem [#allocation2], %s2099_s18  ;;  %v1684_v0 = vadd.f32 %v1312_v62, %v1303_v63  ;;  %s2202_s19 = scalar_lea.hbm %s2262_s14, %s2141_s29 }
 0x2b4   : > { %s1416_s4 = sshll.u32 %s529_s3, 4  ;;  %s2287_s1 = sand.u32 1, %s1862_s22   ;;  %s2204_s4 = int_to_ptr.vmem [resolvable:$true] %s1416_s4 }
 0x2b5   : > { %s1393_s5 = scalar_lea.sflag [#allocation3], %s2287_s1  ;;  %s1804_s9 = scalar_lea.vmem %s2204_s4, 128 }
 0x2b6   : > { %p1805_p7 = scmp.ne.s32.totalorder %s2204_s4, %s1804_s9  ;;  %s1879_s18 = smov [#allocation2]  }
 0x2b7   : > { %s1808_s2 = sshll.u32 %s1879_s18, 4  ;;  %s1809_s2 = int_to_ptr.vmem [resolvable:$false] %s1808_s2 }
 0x2b8   : > { %p1806_p8 = pnand %p1805_p7, %p2005_p5  ;;  %s1810_s25 = scalar_lea.vmem %s1809_s2, 256 }
 0x2b9   : > { %p1811_p10 = scmp.lt.s32.totalorder %s2204_s4, %s1809_s2  ;;  %p1812_p11 = scmp.lt.s32.totalorder %s1810_s25, %s1804_s9 }
 0x2ba   : > { %p1807_p9 = pneg %p1806_p8 }
 0x2bb   : > { %p1813_p12 = por %p1812_p11, %p1811_p10 }
 0x2bd   : > { %p1814_p13 = pnand %p1813_p12, %p1807_p9 }
 0x360   : > { %v1386_v1 = vpop.f32.mrb[2].mxu0 }
 0x361   : > { %v1685_v2 = vadd.f32 %v1684_v0, %v1386_v1  ;;  %v1683_v3 = vpop.f32.mrb[3].mxu0 }
 0x363   : > { %1391 = vst [vmem:[%s529_s3] sm:$0xff] %v1685_v2 }
 0x364   : > { %1817 = shalt.err (!%p1814_p13)
}
 0x365   : > { %s1818_s29 = scalar_lea.hbm %s2202_s19, 128  ;;  %s1822_s3 = scalar_lea.hbm %s2262_s14, 256 }
 0x366   : > { %p1819_p0 = scmp.ne.s32.totalorder %s2202_s19, %s1818_s29  ;;  %p1823_p3 = scmp.lt.u32.totalorder %s2202_s19, %s2262_s14 }
 0x367   : > { %p1824_p4 = scmp.lt.u32.totalorder %s1822_s3, %s1818_s29  ;;  %p1826_p8 = scmp.lt.u32.totalorder %s1818_s29, %s2202_s19 }
 0x368   : > { %p1820_p1 = pnand %p1819_p0, %p2005_p5 }
 0x369   : > { %p1825_p7 = por %p1824_p4, %p1823_p3 }
 0x36a   : > { %p1821_p2 = pneg %p1820_p1 }
 0x36b   : > { %p1827_p9 = por %p1826_p8, %p1825_p7 }
 0x36d   : > { %p1828_p10 = pnand %p1827_p9, %p1821_p2 }
 0x36f   : > { %1831 = shalt.err (!%p1828_p10)
}
 0x370   : > { %1692 = dma.vmem_to_hbm [thread:$0]  (%p2005_p5), %s2204_s4, 128, %s2202_s19, %s1393_s5  }
 0x371 PF: > { %p1708_p11 = scmp.ge.s32.totalorder %s1870_s24, 2  ;;  %s1454_s1 = sand.u32 1, %s1858_s21  }
 0x372   : > { %s1455_s9 = scalar_lea.sflag [#allocation3], %s1454_s1 }
 0x373   : > { %p1699_p12 = pnand %p1708_p11, %p2009_p6 }
 0x375   : > { %1849 = dma.done.wait (!%p1699_p12), %s1455_s9, 128  }
 0x376   : > { %1851 = vsyncadd (!%p1699_p12), %s1455_s9, 4294967168  ;;  %s2288_s18 = sadd.s32 4294967294, %s1870_s24  }
 0x377   : > { %s1463_s2 = sand.u32 1, %s2288_s18  }
 0x378   : > { %s1464_s25 = scalar_lea.sflag [#allocation5], %s1463_s2 }
 0x379   : > { %1853 = dma.done.wait (!%p1699_p12), %s1464_s25, 256  }
 0x37a   : > { %1855 = vsyncadd (!%p1699_p12), %s1464_s25, 4294967040  ;;  %p30_p5 = scmp.ge.s32.totalorder %s1990_s27, 4   ;;  %s2289_s21 = smov %s1862_s22 }
 0x37b   : > { %s2290_s22 = smov %s1866_s23  ;;  %s2291_s23 = smov %s2003_s30 }
 0x37c   : > { %s2292_s24 = smov %s1990_s27  ;;  %32 = sbr.rel (!%p30_p5) target bundleno = 14 (0xe), region = 150 }
 0x383   :  { %1478 = vsyncpa [#allocation3], 1 }
 0x384   :  { %1480 = vsyncpa [#allocation3 + $0x1], 1 }
 0x385   :  { %1481 = vsyncpa [#allocation5], 1 }
 0x386   :  { %1483 = vsyncpa [#allocation5 + $0x1], 1 }

</bundles_post_ra>
